<compile_context>
chip_gen: v6e
topology: v6e:2x2x1
jax: 0.10.0
libtpu: 0.0.40
codegen_flags: <defaults>
</compile_context>

<pallas_src>
import math
import functools

import jax
import jax.numpy as jnp
from jax.experimental import pallas as pl
from jax.experimental.pallas import tpu as pltpu


def _round_up(v, m):
    return ((v + m - 1) // m) * m


# ----------------------------------------------------------------------------
# Kernel
# ----------------------------------------------------------------------------
def critic_kernel(*refs, num_states):
    """refs layout: [x_0..x_{n-1}, w1, b1, w2, b2, w3_row, b3, out]."""
    n = num_states
    x_refs = refs[:n]
    w1_ref, b1_ref, w2_ref, b2_ref, w3_ref, b3_ref, out_ref = refs[n:]

    # layer 1: concat(args) @ W1 as ONE MXU matmul (W1 kept whole), + bias, ReLU
    if n == 1:
        x = x_refs[0][...]
    else:
        x = jnp.concatenate([r[...] for r in x_refs], axis=-1)
    h = jnp.dot(x, w1_ref[...], preferred_element_type=jnp.float32) + b1_ref[...]
    h = jnp.maximum(h, 0.0)

    # layer 2: Linear + ReLU
    h = jnp.dot(h, w2_ref[...], preferred_element_type=jnp.float32) + b2_ref[...]
    h = jnp.maximum(h, 0.0)

    # value head Linear(H, 1): VPU multiply + lane reduction (MXU stays idle
    # for this degenerate N=1 matmul).  w3_ref has shape (1, H).
    v = jnp.sum(h * w3_ref[...], axis=-1, keepdims=True) + b3_ref[...]
    out_ref[...] = v.astype(out_ref.dtype)


# ----------------------------------------------------------------------------
# Wrapper
# ----------------------------------------------------------------------------
def critic_forward(state_args, params, *, block_batch=1024):
    """Q/V value for (state, [goal,] action) vector args, shape (B, 1)."""
    w1, b1, w2, b2, w3, b3 = params

    # Flatten each arg to (B, d_i). For the karolos critic all args are flat
    # per-sample vectors, so this matches torch.cat(args, dim=-1) + Flatten.
    xs = [s.reshape(s.shape[0], -1).astype(jnp.float32) for s in state_args]
    B = xs[0].shape[0]
    assert all(x.shape[0] == B for x in xs)
    in_dim = sum(x.shape[1] for x in xs)
    assert w1.shape[0] == in_dim
    hidden = w1.shape[1]

    # Only degenerate tiny batches get padded up to one 8-row sublane tile.
    # Realistic batches go through unpadded: no extra HBM pass over x, and
    # the ragged last block is handled by Pallas (masked output writes).
    b_eff = B
    if B < 8:
        b_eff = 8
        xs = [jnp.pad(x, ((0, 8 - B), (0, 0))) for x in xs]

    # Batch tile: multiple of 8, roughly <= block_batch, and at least 2 grid
    # steps whenever possible so ("parallel",) shards across both v7x cores.
    if b_eff <= 8:
        tb = 8
    else:
        n_steps = max(2, pl.cdiv(b_eff, block_batch))
        tb = _round_up(pl.cdiv(b_eff, n_steps), 8)
    grid = (pl.cdiv(b_eff, tb),)

    def _const_spec(arr):
        # full-array block, constant index_map -> stays VMEM-resident across
        # grid steps (no re-DMA).  All weights/biases together are < 10 KiB,
        # so VMEM pressure is a non-issue even under v7x's 64 MiB ceiling.
        return pl.BlockSpec(arr.shape, lambda i: (0, 0))

    x_specs = [pl.BlockSpec((tb, x.shape[1]), lambda i: (i, 0)) for x in xs]
    in_specs = (x_specs
                + [_const_spec(w1), _const_spec(b1), _const_spec(w2),
                   _const_spec(b2), _const_spec(w3), _const_spec(b3)])
    out_spec = pl.BlockSpec((tb, 1), lambda i: (i, 0))

    flops = 2 * b_eff * (in_dim * hidden + hidden * hidden + hidden)
    bytes_accessed = int(
        sum(a.size * a.dtype.itemsize for a in (*xs, w1, b1, w2, b2, w3, b3))
        + b_eff * 4)

    value = pl.pallas_call(
        functools.partial(critic_kernel, num_states=len(xs)),
        out_shape=jax.ShapeDtypeStruct((b_eff, 1), jnp.float32),
        grid=grid,
        in_specs=in_specs,
        out_specs=out_spec,
        compiler_params=pltpu.CompilerParams(
            dimension_semantics=("parallel",)),
        cost_estimate=pl.CostEstimate(
            flops=flops, transcendentals=0, bytes_accessed=bytes_accessed),
    )(*xs, w1, b1, w2, b2, w3, b3)

    return value[:B]


# ----------------------------------------------------------------------------
# Parameters (xavier-uniform weights, PyTorch-default uniform biases)
# ----------------------------------------------------------------------------
def _xavier_uniform(key, shape, fan_in, fan_out):
    bound = math.sqrt(6.0 / (fan_in + fan_out))
    return jax.random.uniform(key, shape, jnp.float32, -bound, bound)


def _bias_init(key, shape, fan_in):
    bound = 1.0 / math.sqrt(fan_in)
    return jax.random.uniform(key, shape, jnp.float32, -bound, bound)


def make_critic_params(key, state_dims, hidden):
    in_dims = [int(math.prod(d)) for d in state_dims]
    in_dim = sum(in_dims)
    ks = jax.random.split(key, 6)
    w1 = _xavier_uniform(ks[0], (in_dim, hidden), in_dim, hidden)
    b1 = _bias_init(ks[1], (1, hidden), in_dim)
    w2 = _xavier_uniform(ks[2], (hidden, hidden), hidden, hidden)
    b2 = _bias_init(ks[3], (1, hidden), hidden)
    # value head Linear(hidden, 1): store the weight as its (1, hidden) row
    w3 = _xavier_uniform(ks[4], (1, hidden), hidden, 1)
    b3 = _bias_init(ks[5], (1, 1), hidden)
    return (w1, b1, w2, b2, w3, b3)


def critic_ref(state_args, params):
    """Pure-JAX reference of the same forward pass."""
    w1, b1, w2, b2, w3, b3 = params
    x = jnp.concatenate([s.reshape(s.shape[0], -1) for s in state_args],
                        axis=-1).astype(jnp.float32)
    h = jnp.maximum(x @ w1 + b1, 0.0)
    h = jnp.maximum(h @ w2 + b2, 0.0)
    # head: h @ w3.T + b3, written as the same sum-of-products formulation
    return jnp.sum(h * w3, axis=-1, keepdims=True) + b3


# TODO(synk): 'batchnorm' (needs running stats) and 'dropout' branches of
#             network_structure are not implemented; the demo uses the standard
#             linear/relu critic structure.

if __name__ == "__main__":
    key = jax.random.PRNGKey(0)

    # small shapes: state_dims = [(9,), (4,)] (e.g. state + action) -> in_dim = 13
    batch, hidden = 2, 32
    state_dims = [(9,), (4,)]

    k_par, k_s0, k_s1 = jax.random.split(key, 3)
    params = make_critic_params(k_par, state_dims, hidden)

    state = jax.random.normal(k_s0, (batch,) + state_dims[0], jnp.float32)
    action = jax.random.normal(k_s1, (batch,) + state_dims[1], jnp.float32)

    value = critic_forward([state, action], params)
    value = jax.block_until_ready(value)

    assert value.shape == (batch, 1)
    assert bool(jnp.all(jnp.isfinite(value)))
    ref = critic_ref([state, action], params)
    assert bool(jnp.allclose(value, ref, rtol=5e-4, atol=5e-4))

    # second check: batch that is not a tile multiple -> 2 parallel grid steps
    # with a ragged last block handled by Pallas masking (no wrapper padding).
    batch2 = 50
    k_t0, k_t1 = jax.random.split(jax.random.PRNGKey(1), 2)
    state2 = jax.random.normal(k_t0, (batch2,) + state_dims[0], jnp.float32)
    action2 = jax.random.normal(k_t1, (batch2,) + state_dims[1], jnp.float32)
    value2 = jax.block_until_ready(critic_forward([state2, action2], params))
    ref2 = critic_ref([state2, action2], params)
    assert value2.shape == (batch2, 1)
    assert bool(jnp.all(jnp.isfinite(value2)))
    assert bool(jnp.allclose(value2, ref2, rtol=5e-4, atol=5e-4))

    print("KERNEL_OK")
</pallas_src>

<mosaic_0001>
module attributes {stable_mosaic.version = 11 : i64} {
  func.func @critic_kernel(%arg0: i32, %arg1: memref<8x9xf32, #tpu.memory_space<vmem>>, %arg2: memref<8x4xf32, #tpu.memory_space<vmem>>, %arg3: memref<13x32xf32, #tpu.memory_space<vmem>>, %arg4: memref<1x32xf32, #tpu.memory_space<vmem>>, %arg5: memref<32x32xf32, #tpu.memory_space<vmem>>, %arg6: memref<1x32xf32, #tpu.memory_space<vmem>>, %arg7: memref<1x32xf32, #tpu.memory_space<vmem>>, %arg8: memref<1x1xf32, #tpu.memory_space<vmem>>, %arg9: memref<8x1xf32, #tpu.memory_space<vmem>>) attributes {dimension_semantics = [#tpu.dimension_semantics<parallel>], iteration_bounds = array<i64: 1>, scalar_prefetch = 0 : i64, scratch_operands = 0 : i64, tpu.core_type = #tpu.core_type<tc>, window_params = [{transform_indices = @transform_0, window_bounds = array<i64: 8, 9>}, {transform_indices = @transform_1, window_bounds = array<i64: 8, 4>}, {pipeline_mode = #tpu.pipeline_mode<synchronous>, transform_indices = @transform_2, window_bounds = array<i64: 13, 32>}, {pipeline_mode = #tpu.pipeline_mode<synchronous>, transform_indices = @transform_3, window_bounds = array<i64: 1, 32>}, {pipeline_mode = #tpu.pipeline_mode<synchronous>, transform_indices = @transform_4, window_bounds = array<i64: 32, 32>}, {pipeline_mode = #tpu.pipeline_mode<synchronous>, transform_indices = @transform_5, window_bounds = array<i64: 1, 32>}, {pipeline_mode = #tpu.pipeline_mode<synchronous>, transform_indices = @transform_6, window_bounds = array<i64: 1, 32>}, {pipeline_mode = #tpu.pipeline_mode<synchronous>, transform_indices = @transform_7, window_bounds = array<i64: 1, 1>}, {transform_indices = @transform_8, window_bounds = array<i64: 8, 1>}]} {
    %c0 = arith.constant 0 : index
    %c0_0 = arith.constant 0 : index
    %0 = vector.load %arg1[%c0, %c0_0] : memref<8x9xf32, #tpu.memory_space<vmem>>, vector<8x9xf32>
    %c0_1 = arith.constant 0 : index
    %c0_2 = arith.constant 0 : index
    %1 = vector.load %arg2[%c0_1, %c0_2] : memref<8x4xf32, #tpu.memory_space<vmem>>, vector<8x4xf32>
    %2 = tpu.concatenate %0, %1 in 1 : vector<8x9xf32>, vector<8x4xf32> -> vector<8x13xf32>
    %c0_3 = arith.constant 0 : index
    %c0_4 = arith.constant 0 : index
    %3 = vector.load %arg3[%c0_3, %c0_4] : memref<13x32xf32, #tpu.memory_space<vmem>>, vector<13x32xf32>
    %cst = arith.constant dense<0.000000e+00> : vector<8x32xf32>
    %4 = tpu.matmul %2, %3, %cst {dimension_numbers = #tpu.dot_dimension_numbers<[1], [0], [0], [1], [0, 0, 1, 1], [], []>} : vector<8x13xf32>, vector<13x32xf32>, vector<8x32xf32> -> vector<8x32xf32>
    %c0_5 = arith.constant 0 : index
    %c0_6 = arith.constant 0 : index
    %5 = vector.load %arg4[%c0_5, %c0_6] : memref<1x32xf32, #tpu.memory_space<vmem>>, vector<1x32xf32>
    %6 = vector.broadcast %5 : vector<1x32xf32> to vector<8x32xf32>
    %7 = arith.addf %4, %6 : vector<8x32xf32>
    %cst_7 = arith.constant 0.000000e+00 : f32
    %8 = vector.broadcast %cst_7 : f32 to vector<8x32xf32>
    %9 = arith.maximumf %7, %8 : vector<8x32xf32>
    %c0_8 = arith.constant 0 : index
    %c0_9 = arith.constant 0 : index
    %10 = vector.load %arg5[%c0_8, %c0_9] : memref<32x32xf32, #tpu.memory_space<vmem>>, vector<32x32xf32>
    %cst_10 = arith.constant dense<0.000000e+00> : vector<8x32xf32>
    %11 = tpu.matmul %9, %10, %cst_10 {dimension_numbers = #tpu.dot_dimension_numbers<[1], [0], [0], [1], [0, 0, 1, 1], [], []>} : vector<8x32xf32>, vector<32x32xf32>, vector<8x32xf32> -> vector<8x32xf32>
    %c0_11 = arith.constant 0 : index
    %c0_12 = arith.constant 0 : index
    %12 = vector.load %arg6[%c0_11, %c0_12] : memref<1x32xf32, #tpu.memory_space<vmem>>, vector<1x32xf32>
    %13 = vector.broadcast %12 : vector<1x32xf32> to vector<8x32xf32>
    %14 = arith.addf %11, %13 : vector<8x32xf32>
    %cst_13 = arith.constant 0.000000e+00 : f32
    %15 = vector.broadcast %cst_13 : f32 to vector<8x32xf32>
    %16 = arith.maximumf %14, %15 : vector<8x32xf32>
    %c0_14 = arith.constant 0 : index
    %c0_15 = arith.constant 0 : index
    %17 = vector.load %arg7[%c0_14, %c0_15] : memref<1x32xf32, #tpu.memory_space<vmem>>, vector<1x32xf32>
    %18 = vector.broadcast %17 : vector<1x32xf32> to vector<8x32xf32>
    %19 = arith.mulf %16, %18 : vector<8x32xf32>
    %cst_16 = arith.constant dense<0.000000e+00> : vector<8xf32>
    %20 = vector.multi_reduction <add>, %19, %cst_16 [1] : vector<8x32xf32> to vector<8xf32>
    %21 = vector.shape_cast %20 : vector<8xf32> to vector<8x1xf32>
    %c0_17 = arith.constant 0 : index
    %c0_18 = arith.constant 0 : index
    %22 = vector.load %arg8[%c0_17, %c0_18] : memref<1x1xf32, #tpu.memory_space<vmem>>, vector<1x1xf32>
    %23 = vector.broadcast %22 : vector<1x1xf32> to vector<8x1xf32>
    %24 = arith.addf %21, %23 : vector<8x1xf32>
    %c0_19 = arith.constant 0 : index
    %c0_20 = arith.constant 0 : index
    %25 = vector.load %arg9[%c0_19, %c0_20] : memref<8x1xf32, #tpu.memory_space<vmem>>, vector<8x1xf32>
    tpu.vector_store %arg9[%c0_19, %c0_20], %24 {strides = array<i32>} : memref<8x1xf32, #tpu.memory_space<vmem>>, vector<8x1xf32>,
    return
  }
  func.func @transform_0(%arg0: i32) -> (i32, i32) {
    %c0_i32 = arith.constant 0 : i32
    %c0_i32_0 = arith.constant 0 : i32
    return %arg0, %c0_i32 : i32, i32
  }
  func.func @transform_1(%arg0: i32) -> (i32, i32) {
    %c0_i32 = arith.constant 0 : i32
    %c0_i32_0 = arith.constant 0 : i32
    return %arg0, %c0_i32 : i32, i32
  }
  func.func @transform_2(%arg0: i32) -> (i32, i32) {
    %c0_i32 = arith.constant 0 : i32
    %c0_i32_0 = arith.constant 0 : i32
    %c0_i32_1 = arith.constant 0 : i32
    return %c0_i32, %c0_i32_0 : i32, i32
  }
  func.func @transform_3(%arg0: i32) -> (i32, i32) {
    %c0_i32 = arith.constant 0 : i32
    %c0_i32_0 = arith.constant 0 : i32
    %c0_i32_1 = arith.constant 0 : i32
    return %c0_i32, %c0_i32_0 : i32, i32
  }
  func.func @transform_4(%arg0: i32) -> (i32, i32) {
    %c0_i32 = arith.constant 0 : i32
    %c0_i32_0 = arith.constant 0 : i32
    %c0_i32_1 = arith.constant 0 : i32
    return %c0_i32, %c0_i32_0 : i32, i32
  }
  func.func @transform_5(%arg0: i32) -> (i32, i32) {
    %c0_i32 = arith.constant 0 : i32
    %c0_i32_0 = arith.constant 0 : i32
    %c0_i32_1 = arith.constant 0 : i32
    return %c0_i32, %c0_i32_0 : i32, i32
  }
  func.func @transform_6(%arg0: i32) -> (i32, i32) {
    %c0_i32 = arith.constant 0 : i32
    %c0_i32_0 = arith.constant 0 : i32
    %c0_i32_1 = arith.constant 0 : i32
    return %c0_i32, %c0_i32_0 : i32, i32
  }
  func.func @transform_7(%arg0: i32) -> (i32, i32) {
    %c0_i32 = arith.constant 0 : i32
    %c0_i32_0 = arith.constant 0 : i32
    %c0_i32_1 = arith.constant 0 : i32
    return %c0_i32, %c0_i32_0 : i32, i32
  }
  func.func @transform_8(%arg0: i32) -> (i32, i32) {
    %c0_i32 = arith.constant 0 : i32
    %c0_i32_0 = arith.constant 0 : i32
    return %arg0, %c0_i32 : i32, i32
  }
}

</mosaic_0001>

<bundles_post_ra>
// kernel: tpu_custom_call.1
= control target key start
LH: loop header
LB: loop body
LE: loop exit
PB: predicated region body
PF: predicated region fallthrough
CT: control target
= control target key end

     0   :  { %s432_s0 = inlined_call_operand.hbm [shape: f32[8,9], index: 0, kind: input, shape index: {}]   ;;  %s433_s1 = inlined_call_operand.vmem [shape: f32[8,4], index: 1, kind: input, shape index: {}]   ;;  %s434_s2 = inlined_call_operand.vmem [shape: f32[13,32], index: 2, kind: input, shape index: {}]   ;;  %s435_s3 = inlined_call_operand.vmem [shape: f32[1,32], index: 3, kind: input, shape index: {}]   ;;  %s436_s4 = inlined_call_operand.hbm [shape: f32[32,32], index: 4, kind: input, shape index: {}]   ;;  %s437_s5 = inlined_call_operand.vmem [shape: f32[1,32], index: 5, kind: input, shape index: {}]   ;;  %s438_s6 = inlined_call_operand.vmem [shape: f32[1,32], index: 6, kind: input, shape index: {}]   ;;  %s439_s7 = inlined_call_operand.<no memory space> [shape: f32[1,1], index: 7, kind: input, shape index: {}]   ;;  %s440_s8 = inlined_call_operand.vmem [shape: f32[8,1], index: 8, kind: output, shape index: {}]  }
   0x1   :  { %v13_v0 = vstv %s439_s7 }
   0x2   :  { %14 = vst [vmem:[#allocation2] sm:$0x1] %v13_v0 }
   0x3   :  { %15 = vsyncpa [#allocation4], 0 }
   0x4   :  { %16 = vsyncpa [#allocation6], 0  ;;  %s350_s29 = smov [#allocation3]   ;;  %s351_s9 = smov [#allocation5]  }
   0x5   :  { %s23_s30 = sshll.u32 %s350_s29, 4  ;;  %s38_s10 = sshll.u32 %s351_s9, 4  ;;  %s24_s30 = int_to_ptr.vmem [resolvable:$true] %s23_s30  ;;  %s39_s10 = int_to_ptr.vmem [resolvable:$true] %s38_s10 }
   0x6   :  { %s314_s11 = scalar_lea.vmem %s24_s30, 128  ;;  %p319_p1 = scmp.lt.s32.totalorder %s24_s30, %s24_s30 }
   0x7   :  { %p315_p0 = scmp.ne.s32.totalorder %s24_s30, %s314_s11  ;;  %p320_p2 = scmp.lt.s32.totalorder %s314_s11, %s314_s11 }
   0x9   :  { %p321_p3 = por %p320_p2, %p319_p1 }
   0xb   :  { %p322_p4 = pnand %p321_p3, %p315_p0 }
   0xd   :  { %325 = shalt.err (!%p322_p4)
}
   0xe   :  { %26 = dma.hbm_to_vmem [thread:$0]  %s432_s0, 128, %s24_s30, [#allocation4]  }
   0xf   :  { %s334_s7 = scalar_lea.vmem %s39_s10, 512  ;;  %p339_p6 = scmp.lt.s32.totalorder %s39_s10, %s39_s10 }
  0x10   :  { %p335_p5 = scmp.ne.s32.totalorder %s39_s10, %s334_s7  ;;  %p340_p7 = scmp.lt.s32.totalorder %s334_s7, %s334_s7 }
  0x12   :  { %p341_p8 = por %p340_p7, %p339_p6 }
  0x14   :  { %p342_p9 = pnand %p341_p8, %p335_p5 }
  0x16   :  { %345 = shalt.err (!%p342_p9)
}
  0x17   :  { %s352_s14 = smov 128   ;;  %s353_s15 = smov 8  }
  0x18   :  { %44 = dma.hbm_to_vmem [thread:$0]  %s436_s4, 512, %s39_s10, [#allocation6], %s352_s14, %s352_s14, %s353_s15  }
  0x19   :  { %346 = dma.done.wait [#allocation4], 128  }
  0x1a   :  { %347 = vsyncadd [#allocation4], 4294967168 }
  0x1b   :  { %348 = dma.done.wait [#allocation6], 512  }
  0x1c   :  { %349 = vsyncadd [#allocation6], 4294966784  ;;  %v354_v1 = vmov 0.0   ;;  %vm355_vm0 = vmmov 0   ;;  %vm78_vm1 = vcmask 1044480   ;;  %v58_v2 = vld [vmem:[%s433_s1] sm:$0xff] }
  0x1d   :  { %281 = vmatprep.subr.mxu0 %v354_v1  ;;  %288 = vmatprep.subr.mxu1 %v354_v1  ;;  %v66_v3 = vld [vmem:[%s434_s2 + $0x8] sm:$0x1f]  ;;  %s356_s4 = smov 9   ;;  %v65_v4 = vld [vmem:[%s434_s2] sm:$0xff]  ;;  %vm63_vm2 = vcmask 72704   ;;  %vm74_vm3 = vcmask 105472  }
  0x1e   :  { %285 = vmatprep.mubr.msk.f32.mxu0 %vm355_vm0, %v354_v1  ;;  %296 = vmatprep.mubr.msk.f32.mxu1 %vm355_vm0, %v354_v1  ;;  %v156_v5 = vld [vmem:[#allocation5 + $0x18] sm:$0xff]  ;;  %v155_v9 = vld [vmem:[#allocation5 + $0x10] sm:$0xff]  ;;  %v154_v10 = vld [vmem:[#allocation5 + $0x8] sm:$0xff]  ;;  %vm164_vm4 = vcmask 261120   ;;  %vm258_vm5 = vcmask 7168  }
  0x1f   :  { %60 = vrot.lane.b32.xlu0 %v58_v2, %s356_s4  ;;  %282 = vmatpush3.msk.msra.mxu0 %vm78_vm1, %v66_v3  ;;  %v57_v6 = vld [vmem:[#allocation3] sm:$0xff]  ;;  %v153_v11 = vld [vmem:[#allocation5] sm:$0xff]  ;;  %v266_v12 = vld [vmem:[%s435_s3] ss:$0 sm:$0xff] }
  0x20   :  { %283 = vmatprep.subr.mxu0 %v354_v1  ;;  %289 = vmatpush3.msra.mxu1 %v156_v5  ;;  %v269_v17 = vld [vmem:[%s437_s5] ss:$0 sm:$0xff] }
  0x21   :  { %284 = vmatpush3.msra.mxu0 %v65_v4  ;;  %290 = vmatprep.subr.mxu1 %v354_v1  ;;  %v271_v21 = vld [vmem:[%s438_s6] ss:$0 sm:$0xff] }
  0x22   :  { %291 = vmatpush3.msra.mxu1 %v155_v9  ;;  %v272_v25 = vld [vmem:[#allocation2] ss:$0 sm:$0xff] }
  0x23   :  { %292 = vmatprep.subr.mxu1 %v354_v1 }
  0x24   :  { %293 = vmatpush3.msra.mxu1 %v154_v10 }
  0x25   :  { %294 = vmatprep.subr.mxu1 %v354_v1 }
  0x26   :  { %295 = vmatpush3.msra.mxu1 %v153_v11 }
  0x91   :  { %v61_v7 = vpop.permute.xlu0 %60 }
  0x92   :  { %v64_v8 = vsel %vm63_vm2, %v57_v6, %v61_v7 }
  0x93   :  { %286 = vmatmul.mubr.msk.f32.vlgmr.msra.gmra.mxu0 %vm74_vm3, %v64_v8 }
 0x153   :  { %v148_v13 = vpop.f32.mrf.mxu0 }
 0x154   :  { %v149_v14 = vadd.f32 %v266_v12, %v148_v13 }
 0x155   :  { %v287_v15 = vpop.f32.mrf.mxu0 }
 0x156   :  { %v152_v16 = vmax.f32 %v149_v14, 0.0 }
 0x158   :  { %297 = vmatmul.mubr.msk.f32.vlgmr.msra.gmra.mxu1 %vm164_vm4, %v152_v16 }
 0x218   :  { %v234_v18 = vpop.f32.mrf.mxu1 }
 0x219   :  { %v235_v19 = vadd.f32 %v269_v17, %v234_v18 }
 0x21a   :  { %v298_v20 = vpop.f32.mrf.mxu1 }
 0x21b   :  { %v238_v22 = vmax.f32 %v235_v19, 0.0 }
 0x21d   :  { %v246_v23 = vmul.f32 %v271_v21, %v238_v22 }
 0x21f   :  { %v247_v24 = vsel %vm164_vm4, %v246_v23, 0.0 }
 0x220   :  { %248 = vadd.xlane.f32.xlu0 %v247_v24 }
 0x2a9   :  { %v249_v26 = vpop.xlane.xlu0 %248 }
 0x2aa   :  { %v257_v27 = vadd.f32 %v272_v25, %v249_v26 }
 0x2ac   :  { %259 = vst.msk [vmem:[%s440_s8] sm:$0xff] %vm258_vm5, %v257_v27 }
 0x2ad   :  { %264 = vsyncpa [#allocation4], 1 }
 0x2ae   :  { %265 = vsyncpa [#allocation6], 1 }

</bundles_post_ra>
